<compile_context>
chip_gen: v7x
topology: tpu7x:2x2x1
jax: 0.10.0
libtpu: 0.0.40
codegen_flags: <defaults>
</compile_context>

<pallas_src>
import jax
import jax.numpy as jnp
from jax.experimental import pallas as pl
from jax.experimental.pallas import tpu as pltpu


_LANES = 128
# Below this many batch rows the pallas_call launch/pipeline overhead dwarfs
# the ~KBs of data moved; plain XLA fuses the reduction better.
_PALLAS_MIN_BATCH = 16384


def _round_up(x: int, m: int) -> int:
    return ((x + m - 1) // m) * m


def _lane_sum_kernel(x_ref, o_ref, acc_ref):
    """Per-lane sums of a lane-dense (rows, 128) slab.

    Grid: (num_splits [parallel], tiles_per_split [arbitrary / reduction]).
    acc_ref: (1, 128) f32 VMEM scratch, resident across the reduction axis.
    o_ref:   (1, 128) lane-dense output block (one row per split), written
             only in the epilogue.
    """
    i = pl.program_id(1)

    @pl.when(i == 0)
    def _():
        acc_ref[...] = jnp.zeros_like(acc_ref)

    # In-kernel cast (free on the VPU) + full-width sublane reduce.
    acc_ref[...] += jnp.sum(x_ref[...].astype(jnp.float32), axis=0, keepdims=True)

    @pl.when(i == pl.num_programs(1) - 1)
    def _():
        o_ref[...] = acc_ref[...]


def log_psi_column_sums(log_psi: jax.Array, *, block_rows: int = 4096,
                        num_splits: int = 1) -> jax.Array:
    """Returns a (2,) f32 array: [sum(log_psi[:, 0]), sum(log_psi[:, 1])].

    `num_splits` adds a leading "parallel" grid axis over batch halves; set
    to 2 on v7x (2 TensorCores/chip). Leave at 1 on v5e/v6e.
    """
    bs, two = log_psi.shape
    assert two == 2, "last axis must be (real, imag)"

    total = bs * 2
    flat = log_psi.reshape(-1)  # [r0, i0, r1, i1, ...] — contiguous view

    # Lane-dense view: 128 elements per row (64 interleaved (real, imag) pairs).
    n_rows = pl.cdiv(total, _LANES)
    tile_rows = min(block_rows, _round_up(pl.cdiv(n_rows, num_splits), 8))
    tiles_per_split = pl.cdiv(n_rows, num_splits * tile_rows)
    padded_total = num_splits * tiles_per_split * tile_rows * _LANES
    if padded_total != total:
        # Arbitrary batch sizes: zero-pad the tail (zeros don't change sums).
        flat = jnp.pad(flat, (0, padded_total - total))
    x = flat.reshape(padded_total // _LANES, _LANES)

    itemsize = jnp.dtype(log_psi.dtype).itemsize
    out = pl.pallas_call(
        _lane_sum_kernel,
        out_shape=jax.ShapeDtypeStruct((num_splits, _LANES), jnp.float32),
        grid=(num_splits, tiles_per_split),
        in_specs=[pl.BlockSpec(
            (tile_rows, _LANES),
            lambda p, i: (p * tiles_per_split + i, 0))],
        out_specs=pl.BlockSpec((1, _LANES), lambda p, i: (p, 0)),
        scratch_shapes=[pltpu.VMEM((1, _LANES), jnp.float32)],
        compiler_params=pltpu.CompilerParams(
            dimension_semantics=("parallel", "arbitrary")),
        cost_estimate=pl.CostEstimate(
            flops=padded_total,
            transcendentals=0,
            bytes_accessed=padded_total * itemsize + num_splits * _LANES * 4),
    )(x)

    # out[p, l]: per-split per-lane partials; even lanes = real, odd = imag.
    return out.reshape(num_splits * (_LANES // 2), 2).sum(axis=0)


class Base:
    """JAX/Pallas mirror of the PyTorch `Base` module (no parameters)."""

    def __init__(self, **kwargs):
        self.sampler_type = "MCMC"
        self._cached_log_psi = None
        self._cached_sums = None

    def forward(self, configuration):
        # PyTorch forward body is `pass` -> returns None.
        return None

    def _column_sums(self, log_psi):
        # Both columns are reduced in ONE pass and cached, so log_dev_real /
        # log_dev_imag on the same tensor do not launch the kernel twice.
        if self._cached_log_psi is log_psi:
            return self._cached_sums
        bs = log_psi.shape[0]
        if bs < _PALLAS_MIN_BATCH:
            # Tiny op: bypass Pallas, let XLA fuse it.
            sums = jnp.sum(log_psi.astype(jnp.float32), axis=0)
        else:
            sums = log_psi_column_sums(log_psi)
        self._cached_log_psi = log_psi
        self._cached_sums = sums
        return sums

    def log_dev_real(self, log_psi, model=None):
        # TODO(synk): backpack BatchGrad per-sample parameter gradients have
        # no Pallas equivalent; only the hot-path reduction is implemented.
        return self._column_sums(log_psi)[0]

    def log_dev_imag(self, log_psi, model=None):
        return self._column_sums(log_psi)[1]

    def compute_loss(self, log_psi, local_energies):
        # TODO(synk): Energy.apply is an undefined custom autograd Function.
        return None

    def set_mask_device(self):
        pass


if __name__ == "__main__":
    key = jax.random.PRNGKey(0)
    k1, k2, k3 = jax.random.split(key, 3)

    # log_psi: [batch, 2] with columns (real part, imag part).
    bs = 128
    log_psi = jax.random.normal(k1, (bs, 2), dtype=jnp.float32)

    # 1) Run the Pallas kernel directly.
    sums = log_psi_column_sums(log_psi)
    jax.block_until_ready(sums)
    ref = jnp.sum(log_psi, axis=0)
    assert jnp.allclose(sums, ref, atol=1e-5, rtol=1e-5)

    # 2) Batch NOT a multiple of 64 -> exercises zero-padded tail handling.
    log_psi_tail = jax.random.normal(k2, (100, 2), dtype=jnp.float32)
    sums_tail = log_psi_column_sums(log_psi_tail)
    jax.block_until_ready(sums_tail)
    ref_tail = jnp.sum(log_psi_tail, axis=0)
    assert jnp.allclose(sums_tail, ref_tail, atol=1e-5, rtol=1e-5)

    # 3) Native bf16 input -> in-kernel cast path (no wrapper astype).
    log_psi_bf16 = jax.random.normal(k3, (bs, 2), jnp.float32).astype(jnp.bfloat16)
    sums_bf16 = log_psi_column_sums(log_psi_bf16)
    jax.block_until_ready(sums_bf16)
    ref_bf16 = jnp.sum(log_psi_bf16.astype(jnp.float32), axis=0)
    assert jnp.allclose(sums_bf16, ref_bf16, atol=1e-4, rtol=1e-4)

    # 4) Module-level API (mirrors the PyTorch class; forward() is a no-op).
    base = Base()
    out = base.forward(log_psi)
    assert out is None
    real_sum = base.log_dev_real(log_psi)
    imag_sum = base.log_dev_imag(log_psi)
    jax.block_until_ready((real_sum, imag_sum))
    assert jnp.allclose(real_sum, ref[0], atol=1e-5, rtol=1e-5)
    assert jnp.allclose(imag_sum, ref[1], atol=1e-5, rtol=1e-5)

    print("KERNEL_OK")
</pallas_src>

<mosaic_0001>
module attributes {stable_mosaic.version = 11 : i64} {
  func.func @_lane_sum_kernel(%arg0: i32, %arg1: i32, %arg2: memref<8x128xf32, #tpu.memory_space<vmem>>, %arg3: memref<1x128xf32, #tpu.memory_space<vmem>>, %arg4: memref<1x128xf32, #tpu.memory_space<vmem>>) attributes {dimension_semantics = [#tpu.dimension_semantics<parallel>, #tpu.dimension_semantics<arbitrary>], iteration_bounds = array<i64: 1, 1>, scalar_prefetch = 0 : i64, scratch_operands = 1 : i64, tpu.core_type = #tpu.core_type<tc>, window_params = [{transform_indices = @transform_0, window_bounds = array<i64: 8, 128>}, {transform_indices = @transform_1, window_bounds = array<i64: 1, 128>}]} {
    %c0_i32 = arith.constant 0 : i32
    %0 = arith.cmpi eq, %arg1, %c0_i32 : i32
    %1 = arith.extui %0 : i1 to i32
    %c0_i32_0 = arith.constant 0 : i32
    %2 = arith.cmpi ne, %1, %c0_i32_0 : i32
    scf.if %2 {
      %cst_8 = arith.constant 0.000000e+00 : f32
      %12 = vector.broadcast %cst_8 : f32 to vector<1x128xf32>
      %c0_9 = arith.constant 0 : index
      %c0_10 = arith.constant 0 : index
      %13 = vector.load %arg4[%c0_9, %c0_10] : memref<1x128xf32, #tpu.memory_space<vmem>>, vector<1x128xf32>
      tpu.vector_store %arg4[%c0_9, %c0_10], %12 {strides = array<i32>} : memref<1x128xf32, #tpu.memory_space<vmem>>, vector<1x128xf32>,
    } else {
    }
    %c0 = arith.constant 0 : index
    %c0_1 = arith.constant 0 : index
    %3 = vector.load %arg4[%c0, %c0_1] : memref<1x128xf32, #tpu.memory_space<vmem>>, vector<1x128xf32>
    %c0_2 = arith.constant 0 : index
    %c0_3 = arith.constant 0 : index
    %4 = vector.load %arg2[%c0_2, %c0_3] : memref<8x128xf32, #tpu.memory_space<vmem>>, vector<8x128xf32>
    %cst = arith.constant dense<0.000000e+00> : vector<128xf32>
    %5 = vector.multi_reduction <add>, %4, %cst [0] : vector<8x128xf32> to vector<128xf32>
    %6 = vector.shape_cast %5 : vector<128xf32> to vector<1x128xf32>
    %7 = arith.addf %3, %6 : vector<1x128xf32>
    %c0_4 = arith.constant 0 : index
    %c0_5 = arith.constant 0 : index
    %8 = vector.load %arg4[%c0_4, %c0_5] : memref<1x128xf32, #tpu.memory_space<vmem>>, vector<1x128xf32>
    tpu.vector_store %arg4[%c0_4, %c0_5], %7 {strides = array<i32>} : memref<1x128xf32, #tpu.memory_space<vmem>>, vector<1x128xf32>,
    %c0_i32_6 = arith.constant 0 : i32
    %9 = arith.cmpi eq, %arg1, %c0_i32_6 : i32
    %10 = arith.extui %9 : i1 to i32
    %c0_i32_7 = arith.constant 0 : i32
    %11 = arith.cmpi ne, %10, %c0_i32_7 : i32
    scf.if %11 {
      %c0_8 = arith.constant 0 : index
      %c0_9 = arith.constant 0 : index
      %12 = vector.load %arg4[%c0_8, %c0_9] : memref<1x128xf32, #tpu.memory_space<vmem>>, vector<1x128xf32>
      %c0_10 = arith.constant 0 : index
      %c0_11 = arith.constant 0 : index
      %13 = vector.load %arg3[%c0_10, %c0_11] : memref<1x128xf32, #tpu.memory_space<vmem>>, vector<1x128xf32>
      tpu.vector_store %arg3[%c0_10, %c0_11], %12 {strides = array<i32>} : memref<1x128xf32, #tpu.memory_space<vmem>>, vector<1x128xf32>,
    } else {
    }
    return
  }
  func.func @transform_0(%arg0: i32, %arg1: i32) -> (i32, i32) {
    %c1_i32 = arith.constant 1 : i32
    %0 = arith.muli %arg0, %c1_i32 : i32
    %1 = arith.addi %0, %arg1 : i32
    %c0_i32 = arith.constant 0 : i32
    %c0_i32_0 = arith.constant 0 : i32
    return %1, %c0_i32 : i32, i32
  }
  func.func @transform_1(%arg0: i32, %arg1: i32) -> (i32, i32) {
    %c0_i32 = arith.constant 0 : i32
    %c0_i32_0 = arith.constant 0 : i32
    return %arg0, %c0_i32 : i32, i32
  }
}

</mosaic_0001>

<bundles_post_ra>
// kernel: tpu_custom_call.1
= control target key start
LH: loop header
LB: loop body
LE: loop exit
PB: predicated region body
PF: predicated region fallthrough
CT: control target
= control target key end

     0   :  { %6 = vsyncpa [#allocation4], 0  ;;  %s148_s0 = inlined_call_operand.hbm [shape: f32[8,128], index: 0, kind: input, shape index: {}]   ;;  %s149_s1 = inlined_call_operand.hbm [shape: f32[1,128], index: 1, kind: output, shape index: {}]  }
   0x1   :  { %7 = vsyncpa [#allocation5], 0  ;;  %s111_s6 = smov [#allocation3]   ;;  %s63_s10 = scalar_lea.hbm %s148_s0, 128 }
   0x2   :  { %s17_s7 = sshll.u32 %s111_s6, 4  ;;  %p64_p0 = scmp.ne.s32.totalorder %s148_s0, %s63_s10  ;;  %s18_s7 = int_to_ptr.vmem [resolvable:$true] %s17_s7 }
   0x3   :  { %p67_p1 = scmp.lt.u32.totalorder %s63_s10, %s148_s0 }
   0x5   :  { %p69_p2 = pnand %p67_p1, %p64_p0 }
   0x7   :  { %72 = shalt.err (!%p69_p2)
}
   0x8   :  { %s73_s15 = scalar_lea.vmem %s18_s7, 128  ;;  %p78_p4 = scmp.lt.s32.totalorder %s18_s7, %s18_s7 }
   0x9   :  { %p74_p3 = scmp.ne.s32.totalorder %s18_s7, %s73_s15  ;;  %p79_p5 = scmp.lt.s32.totalorder %s73_s15, %s73_s15 }
   0xb   :  { %p80_p6 = por %p79_p5, %p78_p4 }
   0xd   :  { %p81_p7 = pnand %p80_p6, %p74_p3 }
   0xf   :  { %84 = shalt.err (!%p81_p7)
}
  0x10   :  { %20 = dma.hbm_to_vmem [thread:$0]  %s148_s0, 128, %s18_s7, [#allocation4]  }
  0x11   :  { %107 = dma.done.wait [#allocation4], 128  }
  0x12   :  { %108 = vsyncadd [#allocation4], 4294967168  ;;  %v112_v0 = vmov 0.0   ;;  %v31_v1 = vld [vmem:[#allocation3] sm:$0xff]  ;;  %s113_s18 = smov [#allocation6]  }
  0x13   :  { %29 = vst [vmem:[#allocation2] sm:$0x1] %v112_v0  ;;  %v32_v2 = vrot.slane %v31_v1, 4  ;;  %s51_s19 = sshll.u32 %s113_s18, 4  ;;  %s52_s19 = int_to_ptr.vmem [resolvable:$true] %s51_s19 }
  0x14   :  { %s85_s0 = scalar_lea.vmem %s52_s19, 16  ;;  %s89_s20 = scalar_lea.vmem %s52_s19, 32 }
  0x15   :  { %v33_v3 = vadd.f32 %v32_v2, %v31_v1  ;;  %p86_p8 = scmp.ne.s32.totalorder %s52_s19, %s85_s0  ;;  %p90_p9 = scmp.lt.s32.totalorder %s52_s19, %s52_s19 }
  0x16   :  { %p91_p10 = scmp.lt.s32.totalorder %s89_s20, %s85_s0 }
  0x17   :  { %v34_v4 = vrot.slane %v33_v3, 2 }
  0x18   :  { %p92_p11 = por %p91_p10, %p90_p9 }
  0x19   :  { %v35_v5 = vadd.f32 %v34_v4, %v33_v3 }
  0x1a   :  { %v30_v7 = vld [vmem:[#allocation2] sm:$0x1]  ;;  %p93_p12 = pnand %p92_p11, %p86_p8 }
  0x1b   :  { %v36_v6 = vrot.slane %v35_v5, 1 }
  0x1d   :  { %v37_v8 = vadd.f32 %v36_v6, %v35_v5 }
  0x1f   :  { %v38_v9 = vadd.f32 %v37_v8, %v30_v7 }
  0x21   :  { %39 = vst [vmem:[#allocation2] sm:$0x1] %v38_v9 }
  0x28   :  { %v43_v10 = vld [vmem:[#allocation2] sm:$0x1] }
  0x29   :  { %44 = vst [vmem:[#allocation6] sm:$0x1] %v43_v10 }
  0x2a   :  { %96 = shalt.err (!%p93_p12)
}
  0x2b   :  { %s97_s23 = scalar_lea.hbm %s149_s1, 16 }
  0x2c   :  { %p98_p13 = scmp.ne.s32.totalorder %s149_s1, %s97_s23  ;;  %p101_p0 = scmp.lt.u32.totalorder %s97_s23, %s149_s1 }
  0x2e   :  { %p103_p1 = pnand %p101_p0, %p98_p13 }
  0x30   :  { %106 = shalt.err (!%p103_p1)
}
  0x31   :  { %54 = dma.vmem_to_hbm [thread:$0]  %s52_s19, 16, %s149_s1, [#allocation5]  }
  0x32   :  { %109 = dma.done.wait [#allocation5], 16  }
  0x33   :  { %110 = vsyncadd [#allocation5], 4294967280 }
  0x34   :  { %58 = vsyncpa [#allocation4], 1 }
  0x35   :  { %59 = vsyncpa [#allocation5], 1 }

</bundles_post_ra>
